<compile_context>
chip_gen: v7x
topology: tpu7x:2x2x1
jax: 0.10.0
libtpu: 0.0.40
codegen_flags: <defaults>
</compile_context>

<pallas_src>
import functools

import jax
import jax.numpy as jnp
from jax import lax
from jax.experimental import pallas as pl
from jax.experimental.pallas import tpu as pltpu


_LANES = 128
_T_MAX = 32768                      # pixels per grid step (multiple of 128)
_CHUNK_MAX = 512                    # lanes per in-kernel compute chunk
_VMEM_LIMIT = 48 * 1024 * 1024      # fits double-buffered f32 32K-pixel tiles


def _round_up(x, m):
    return ((x + m - 1) // m) * m


def _cdiv(a, b):
    return -(-a // b)


def _lane_fold(v):
    """(R, T) -> (R, 128) lane-partial sums via 128-aligned chunk adds (VPU only)."""
    t = v.shape[-1]
    acc = v[:, 0:_LANES]
    for c in range(1, t // _LANES):
        acc = acc + v[:, c * _LANES:(c + 1) * _LANES]
    return acc


def _make_kernel(*, tile, chunk, hw_true, masked, n_inner, ce_row,
                 input_slice, target_slice, sub):
    s0, s1, s2 = input_slice
    t0, t1, _ = target_slice
    c1 = s0 + s1
    c2 = s0 + s1 + s2
    n_chunks = tile // chunk

    def kernel(scales_ref, pred_ref, tgt_ref, out_ref):
        # pred_ref: (C, tile)  tgt_ref: (CT, tile)  out_ref: (out_rows, 128) f32
        t = pl.program_id(2)

        @pl.when(t == 0)
        def _init():
            out_ref[...] = jnp.zeros_like(out_ref)

        sc_rooms = scales_ref[0]          # exp(-log_vars[0]) > 0
        sc_icons = scales_ref[1]          # exp(-log_vars[1]) > 0
        pix_base = (pl.program_id(1) * n_inner + t) * tile

        def ce_pair(logits, labels, scale, valid):
            # logits (Cg, chunk) f32, labels (1, chunk) i32, scale scalar > 0.
            onehot = lax.broadcasted_iota(jnp.int32, logits.shape, 0) == labels
            picked = jnp.sum(jnp.where(onehot, logits, 0.0), axis=0, keepdims=True)
            m = jnp.max(logits, axis=0, keepdims=True)
            z = logits - m                # shared by scaled + unscaled softmax
            lse = m + jnp.log(jnp.sum(jnp.exp(z), axis=0, keepdims=True))
            lse_s = scale * m + jnp.log(
                jnp.sum(jnp.exp(scale * z), axis=0, keepdims=True))
            ce_s = lse_s - scale * picked
            ce_r = lse - picked
            if valid is not None:         # select(): tail NaN/Inf never leaks
                ce_s = jnp.where(valid, ce_s, 0.0)
                ce_r = jnp.where(valid, ce_r, 0.0)
            return ce_s, ce_r

        def chunk_step(start, carry):
            heat_acc, rs_acc, is_acc, rr_acc, ir_acc = carry
            lanes = pl.ds(start, chunk)

            if masked:
                pix = (pix_base + start
                       + lax.broadcasted_iota(jnp.int32, (1, chunk), 1))
                valid = pix < hw_true
            else:
                valid = None

            # Heatmap squared error, kept per task (21 rows).
            d = (pred_ref[0:s0, lanes].astype(jnp.float32)
                 - tgt_ref[0:t0, lanes].astype(jnp.float32))
            dd = d * d
            if valid is not None:
                dd = jnp.where(valid, dd, 0.0)
            heat_acc = heat_acc + _lane_fold(dd)

            rooms_lab = tgt_ref[t0:t0 + 1, lanes].astype(jnp.int32) - sub
            icons_lab = tgt_ref[t0 + t1:t0 + t1 + 1, lanes].astype(jnp.int32) - sub
            # TODO(synk): out-of-range / ignore-index labels are not rejected;
            # they degrade CE to plain logsumexp (picked contribution = 0).

            ce_rs, ce_rr = ce_pair(pred_ref[s0:c1, lanes].astype(jnp.float32),
                                   rooms_lab, sc_rooms, valid)
            ce_is, ce_ir = ce_pair(pred_ref[c1:c2, lanes].astype(jnp.float32),
                                   icons_lab, sc_icons, valid)
            return (heat_acc,
                    rs_acc + _lane_fold(ce_rs), is_acc + _lane_fold(ce_is),
                    rr_acc + _lane_fold(ce_rr), ir_acc + _lane_fold(ce_ir))

        init = (jnp.zeros((s0, _LANES), jnp.float32),
                jnp.zeros((1, _LANES), jnp.float32),
                jnp.zeros((1, _LANES), jnp.float32),
                jnp.zeros((1, _LANES), jnp.float32),
                jnp.zeros((1, _LANES), jnp.float32))

        if n_chunks == 1:
            carry = chunk_step(0, init)
        else:
            carry = lax.fori_loop(
                0, n_chunks,
                lambda ci, c: chunk_step(pl.multiple_of(ci * chunk, chunk), c),
                init, unroll=2)

        heat_acc, rs_acc, is_acc, rr_acc, ir_acc = carry
        out_ref[0:s0, :] += heat_acc
        out_ref[ce_row:ce_row + 4, :] += jnp.concatenate(
            [rs_acc, is_acc, rr_acc, ir_acc], axis=0)

    return kernel


def _run_loss_kernel(scales, pred, tgt, *, hw_true, input_slice, target_slice, sub):
    N, C, hw_arr = pred.shape
    CT = tgt.shape[1]
    s0 = input_slice[0]

    # Pixel tile (DMA unit) + in-kernel compute chunk (vreg-resident unit).
    if hw_arr <= _T_MAX:
        tile = hw_arr
        chunk = _LANES
        while chunk * 2 <= _CHUNK_MAX and tile % (chunk * 2) == 0:
            chunk *= 2
    else:
        chunk = _CHUNK_MAX
        n0 = _cdiv(hw_arr, _T_MAX)
        tile = _round_up(_cdiv(hw_arr, n0), chunk)
    n_tiles = _cdiv(hw_arr, tile)
    masked = (n_tiles * tile != hw_true)

    # v7x: split the pixel-tile axis into a leading parallel group so both
    # TensorCores get work even at batch 1 (even split only, so no block index
    # ever points past the array). Harmless on single-core v5e/v6e.
    if n_tiles >= 2 and n_tiles % 2 == 0:
        groups, n_inner = 2, n_tiles // 2
    else:
        groups, n_inner = 1, n_tiles

    ce_row = _round_up(s0, 8)            # 8-aligned CE rows -> aligned slab +=
    out_rows = _round_up(ce_row + 4, 8)

    kernel = _make_kernel(tile=tile, chunk=chunk, hw_true=hw_true, masked=masked,
                          n_inner=n_inner, ce_row=ce_row,
                          input_slice=tuple(input_slice),
                          target_slice=tuple(target_slice), sub=sub)

    acc = pl.pallas_call(
        kernel,
        out_shape=jax.ShapeDtypeStruct((N, groups, out_rows, _LANES), jnp.float32),
        grid=(N, groups, n_inner),
        in_specs=[
            pl.BlockSpec(memory_space=pltpu.MemorySpace.SMEM),             # scales (2,)
            pl.BlockSpec((None, C, tile), lambda b, g, t: (b, 0, g * n_inner + t)),
            pl.BlockSpec((None, CT, tile), lambda b, g, t: (b, 0, g * n_inner + t)),
        ],
        out_specs=pl.BlockSpec((None, None, out_rows, _LANES),
                               lambda b, g, t: (b, g, 0, 0)),
        compiler_params=pltpu.CompilerParams(
            dimension_semantics=("parallel", "parallel", "arbitrary"),
            vmem_limit_bytes=_VMEM_LIMIT),
    )(scales, pred, tgt)
    return acc, ce_row


@functools.partial(jax.jit, static_argnames=("input_slice", "target_slice", "sub"))
def uncertainty_loss(inp, target, log_vars, log_vars_mse,
                     input_slice=(21, 13, 17), target_slice=(21, 1, 1), sub=0):
    """Returns (loss_var, aux) matching UncertaintyLoss.forward and side losses."""
    n, c, h, w = inp.shape
    nt, ct, ht, wt = target.shape
    # TODO(synk): nearest-neighbor target resize branch (h != ht or w != wt) of
    # the PyTorch module is not implemented; assumes equal-resolution inputs.
    s0, s1, s2 = input_slice
    t0, t1, _ = target_slice
    assert s0 == t0, "heatmap pred/target channel counts must match"

    hw = h * w
    pred = inp.reshape(n, c, hw)          # free reshape; keep native dtype in HBM
    tgt = target.reshape(nt, ct, ht * wt)
    if hw % _LANES != 0:
        # TODO(synk): non-128-multiple spatial sizes still pay one small pad
        # copy so the array's last dim is lane-aligned; the padded tail is
        # masked out inside the kernel anyway.
        pad = _round_up(hw, _LANES) - hw
        pred = jnp.pad(pred, ((0, 0), (0, 0), (0, pad)))
        tgt = jnp.pad(tgt, ((0, 0), (0, 0), (0, pad)))

    scales = jnp.exp(-log_vars).astype(jnp.float32).reshape(2)

    acc, ce_row = _run_loss_kernel(scales, pred, tgt, hw_true=hw,
                                   input_slice=input_slice,
                                   target_slice=target_slice, sub=sub)

    sums = jnp.sum(acc, axis=(0, 1, 3))       # tiny cross-lane reduce in XLA
    heat_sums = sums[:s0]                     # per-task sum of squared error
    ce_rs = sums[ce_row]
    ce_is = sums[ce_row + 1]
    ce_rr = sums[ce_row + 2]
    ce_ir = sums[ce_row + 3]

    denom = jnp.float32(n * hw)
    loss_rooms_var = ce_rs / denom
    loss_icons_var = ce_is / denom
    loss_rooms = ce_rr / denom
    loss_icons = ce_ir / denom

    mse_per_task = heat_sums / denom
    loss_heatmap_var = jnp.sum(jnp.exp(-log_vars_mse) * mse_per_task
                               + jnp.log1p(jnp.exp(log_vars_mse)))
    loss_heatmap = jnp.sum(heat_sums) / (denom * s0)

    loss = loss_rooms + loss_icons + loss_heatmap
    loss_var = loss_rooms_var + loss_icons_var + loss_heatmap_var
    return loss_var, {
        "loss": loss,
        "loss_rooms": loss_rooms, "loss_rooms_var": loss_rooms_var,
        "loss_icons": loss_icons, "loss_icons_var": loss_icons_var,
        "loss_heatmap": loss_heatmap, "loss_heatmap_var": loss_heatmap_var,
    }


# ------------------------------ pure-JAX reference ----------------------------
def _reference(inp, target, log_vars, log_vars_mse,
               input_slice=(21, 13, 17), target_slice=(21, 1, 1), sub=0):
    s0, s1, s2 = input_slice
    t0, t1, _ = target_slice
    heat_pred = inp[:, :s0].astype(jnp.float32)
    rooms_pred = inp[:, s0:s0 + s1].astype(jnp.float32)
    icons_pred = inp[:, s0 + s1:].astype(jnp.float32)
    heat_tgt = target[:, :t0].astype(jnp.float32)
    rooms_lbl = target[:, t0].astype(jnp.int32) - sub
    icons_lbl = target[:, t0 + t1].astype(jnp.int32) - sub

    def ce(logits_nchw, labels_nhw):
        lg = jnp.transpose(logits_nchw, (0, 2, 3, 1))
        lse = jax.scipy.special.logsumexp(lg, axis=-1)
        picked = jnp.take_along_axis(lg, labels_nhw[..., None], axis=-1)[..., 0]
        return jnp.mean(lse - picked)

    n, _, h, w = inp.shape
    diff = (heat_pred - heat_tgt) ** 2
    mse_per_task = jnp.sum(diff, axis=(0, 2, 3)) / (n * h * w)
    heat_var = jnp.sum(jnp.exp(-log_vars_mse) * mse_per_task
                       + jnp.log1p(jnp.exp(log_vars_mse)))
    return (ce(rooms_pred * jnp.exp(-log_vars[0]), rooms_lbl)
            + ce(icons_pred * jnp.exp(-log_vars[1]), icons_lbl)
            + heat_var)


if __name__ == "__main__":
    key = jax.random.PRNGKey(0)

    input_slice = (21, 13, 17)          # heatmap tasks, room classes, icon classes
    target_slice = (21, 1, 1)
    C = sum(input_slice)                # 51
    log_vars = jnp.array([0.1, -0.2], dtype=jnp.float32)
    log_vars_mse = jnp.linspace(-0.3, 0.3, input_slice[0], dtype=jnp.float32)

    def make_inputs(k, n, h, w):
        k1, k2, k3, k4 = jax.random.split(k, 4)
        x = jax.random.normal(k1, (n, C, h, w), dtype=jnp.float32)
        heat = jax.random.normal(k2, (n, input_slice[0], h, w), dtype=jnp.float32)
        rooms = jax.random.randint(k3, (n, 1, h, w), 0,
                                   input_slice[1]).astype(jnp.float32)
        icons = jax.random.randint(k4, (n, 1, h, w), 0,
                                   input_slice[2]).astype(jnp.float32)
        return x, jnp.concatenate([heat, rooms, icons], axis=1)   # (n, 23, h, w)

    ka, kb = jax.random.split(key)
    ok = True

    # Case 1: lane-aligned spatial size (single static compute chunk).
    x, tgt = make_inputs(ka, 2, 16, 16)
    lv, _ = uncertainty_loss(x, tgt, log_vars, log_vars_mse,
                             input_slice=input_slice,
                             target_slice=target_slice, sub=0)
    lv = jax.block_until_ready(lv)
    ref = _reference(x, tgt, log_vars, log_vars_mse, input_slice, target_slice, 0)
    ok &= bool(jnp.isfinite(lv)) and bool(jnp.allclose(lv, ref, rtol=1e-3, atol=1e-4))

    # Case 2: ragged spatial size (exercises the in-kernel tail mask and the
    # chunked fori_loop accumulation path).
    x2, tgt2 = make_inputs(kb, 1, 36, 36)
    lv2, _ = uncertainty_loss(x2, tgt2, log_vars, log_vars_mse,
                              input_slice=input_slice,
                              target_slice=target_slice, sub=0)
    lv2 = jax.block_until_ready(lv2)
    ref2 = _reference(x2, tgt2, log_vars, log_vars_mse, input_slice, target_slice, 0)
    ok &= bool(jnp.isfinite(lv2)) and bool(jnp.allclose(lv2, ref2, rtol=1e-3, atol=1e-4))

    assert ok, "Pallas UncertaintyLoss does not match the JAX reference"
    print("KERNEL_OK")
</pallas_src>

<mosaic_0001>
module attributes {stable_mosaic.version = 11 : i64} {
  func.func @kernel(%arg0: i32, %arg1: i32, %arg2: i32, %arg3: memref<2xf32, #tpu.memory_space<smem>>, %arg4: memref<1x51x256xf32, #tpu.memory_space<vmem>>, %arg5: memref<1x23x256xf32, #tpu.memory_space<vmem>>, %arg6: memref<1x1x32x128xf32, #tpu.memory_space<vmem>>) attributes {dimension_semantics = [#tpu.dimension_semantics<parallel>, #tpu.dimension_semantics<parallel>, #tpu.dimension_semantics<arbitrary>], iteration_bounds = array<i64: 2, 1, 1>, scalar_prefetch = 0 : i64, scratch_operands = 0 : i64, tpu.core_type = #tpu.core_type<tc>, window_params = [{transform_indices = @transform_0, window_bounds = array<i64: 2>}, {transform_indices = @transform_1, window_bounds = array<i64: 1, 51, 256>}, {transform_indices = @transform_2, window_bounds = array<i64: 1, 23, 256>}, {transform_indices = @transform_3, window_bounds = array<i64: 1, 1, 32, 128>}]} {
    %c0_i32 = arith.constant 0 : i32
    %0 = arith.cmpi eq, %arg2, %c0_i32 : i32
    %1 = arith.extui %0 : i1 to i32
    %c0_i32_0 = arith.constant 0 : i32
    %2 = arith.cmpi ne, %1, %c0_i32_0 : i32
    scf.if %2 {
      %cst_47 = arith.constant 0.000000e+00 : f32
      %121 = vector.broadcast %cst_47 : f32 to vector<32x128xf32>
      %c0_48 = arith.constant 0 : index
      %c0_49 = arith.constant 0 : index
      %c0_50 = arith.constant 0 : index
      %c0_51 = arith.constant 0 : index
      %122 = vector.load %arg6[%c0_48, %c0_49, %c0_50, %c0_51] : memref<1x1x32x128xf32, #tpu.memory_space<vmem>>, vector<1x1x32x128xf32>
      %123 = vector.shape_cast %122 : vector<1x1x32x128xf32> to vector<32x128xf32>
      %124 = vector.shape_cast %121 : vector<32x128xf32> to vector<1x1x32x128xf32>
      tpu.vector_store %arg6[%c0_48, %c0_49, %c0_50, %c0_51], %124 {strides = array<i32>} : memref<1x1x32x128xf32, #tpu.memory_space<vmem>>, vector<1x1x32x128xf32>,
    } else {
    }
    %c0 = arith.constant 0 : index
    %3 = memref.load %arg3[%c0] : memref<2xf32, #tpu.memory_space<smem>>
    %c1 = arith.constant 1 : index
    %4 = memref.load %arg3[%c1] : memref<2xf32, #tpu.memory_space<smem>>
    %cst = arith.constant 0.000000e+00 : f32
    %5 = vector.broadcast %cst : f32 to vector<21x128xf32>
    %cst_1 = arith.constant 0.000000e+00 : f32
    %6 = vector.broadcast %cst_1 : f32 to vector<1x128xf32>
    %cst_2 = arith.constant 0.000000e+00 : f32
    %7 = vector.broadcast %cst_2 : f32 to vector<1x128xf32>
    %cst_3 = arith.constant 0.000000e+00 : f32
    %8 = vector.broadcast %cst_3 : f32 to vector<1x128xf32>
    %cst_4 = arith.constant 0.000000e+00 : f32
    %9 = vector.broadcast %cst_4 : f32 to vector<1x128xf32>
    %c0_5 = arith.constant 0 : index
    %c0_6 = arith.constant 0 : index
    %c0_7 = arith.constant 0 : index
    %10 = vector.load %arg4[%c0_5, %c0_6, %c0_7] : memref<1x51x256xf32, #tpu.memory_space<vmem>>, vector<1x21x256xf32>
    %11 = vector.shape_cast %10 : vector<1x21x256xf32> to vector<21x256xf32>
    %c0_8 = arith.constant 0 : index
    %c0_9 = arith.constant 0 : index
    %c0_10 = arith.constant 0 : index
    %12 = vector.load %arg5[%c0_8, %c0_9, %c0_10] : memref<1x23x256xf32, #tpu.memory_space<vmem>>, vector<1x21x256xf32>
    %13 = vector.shape_cast %12 : vector<1x21x256xf32> to vector<21x256xf32>
    %14 = arith.subf %11, %13 : vector<21x256xf32>
    %15 = arith.mulf %14, %14 : vector<21x256xf32>
    %16 = vector.extract_strided_slice %15 {offsets = [0, 0], sizes = [21, 128], strides = [1, 1]} : vector<21x256xf32> to vector<21x128xf32>
    %17 = vector.extract_strided_slice %15 {offsets = [0, 128], sizes = [21, 128], strides = [1, 1]} : vector<21x256xf32> to vector<21x128xf32>
    %18 = arith.addf %16, %17 : vector<21x128xf32>
    %19 = arith.addf %5, %18 : vector<21x128xf32>
    %c0_11 = arith.constant 0 : index
    %c21 = arith.constant 21 : index
    %c0_12 = arith.constant 0 : index
    %20 = vector.load %arg5[%c0_11, %c21, %c0_12] : memref<1x23x256xf32, #tpu.memory_space<vmem>>, vector<1x1x256xf32>
    %21 = vector.shape_cast %20 : vector<1x1x256xf32> to vector<1x256xf32>
    %22 = arith.fptosi %21 : vector<1x256xf32> to vector<1x256xi32>
    %c0_i32_13 = arith.constant 0 : i32
    %23 = vector.broadcast %c0_i32_13 : i32 to vector<1x256xi32>
    %24 = arith.subi %22, %23 : vector<1x256xi32>
    %c0_14 = arith.constant 0 : index
    %c22 = arith.constant 22 : index
    %c0_15 = arith.constant 0 : index
    %25 = vector.load %arg5[%c0_14, %c22, %c0_15] : memref<1x23x256xf32, #tpu.memory_space<vmem>>, vector<1x1x256xf32>
    %26 = vector.shape_cast %25 : vector<1x1x256xf32> to vector<1x256xf32>
    %27 = arith.fptosi %26 : vector<1x256xf32> to vector<1x256xi32>
    %c0_i32_16 = arith.constant 0 : i32
    %28 = vector.broadcast %c0_i32_16 : i32 to vector<1x256xi32>
    %29 = arith.subi %27, %28 : vector<1x256xi32>
    %c0_17 = arith.constant 0 : index
    %c21_18 = arith.constant 21 : index
    %c0_19 = arith.constant 0 : index
    %30 = vector.load %arg4[%c0_17, %c21_18, %c0_19] : memref<1x51x256xf32, #tpu.memory_space<vmem>>, vector<1x13x256xf32>
    %31 = vector.shape_cast %30 : vector<1x13x256xf32> to vector<13x256xf32>
    %32 = tpu.iota {dimensions = array<i32: 0>} : vector<13x256xi32>
    %33 = vector.broadcast %24 : vector<1x256xi32> to vector<13x256xi32>
    %34 = arith.cmpi eq, %32, %33 : vector<13x256xi32>
    %cst_20 = arith.constant 0.000000e+00 : f32
    %35 = vector.broadcast %cst_20 : f32 to vector<13x256xf32>
    %36 = arith.select %34, %31, %35 : vector<13x256xi1>, vector<13x256xf32>
    %cst_21 = arith.constant dense<0.000000e+00> : vector<256xf32>
    %37 = vector.multi_reduction <add>, %36, %cst_21 [0] : vector<13x256xf32> to vector<256xf32>
    %38 = vector.shape_cast %37 : vector<256xf32> to vector<1x256xf32>
    %cst_22 = arith.constant dense<0xFF800000> : vector<256xf32>
    %39 = vector.multi_reduction <maximumf>, %31, %cst_22 [0] : vector<13x256xf32> to vector<256xf32>
    %40 = vector.shape_cast %39 : vector<256xf32> to vector<1x256xf32>
    %41 = vector.broadcast %40 : vector<1x256xf32> to vector<13x256xf32>
    %42 = arith.subf %31, %41 : vector<13x256xf32>
    %43 = math.exp %42 : vector<13x256xf32>
    %cst_23 = arith.constant dense<0.000000e+00> : vector<256xf32>
    %44 = vector.multi_reduction <add>, %43, %cst_23 [0] : vector<13x256xf32> to vector<256xf32>
    %45 = vector.shape_cast %44 : vector<256xf32> to vector<1x256xf32>
    %46 = math.log %45 : vector<1x256xf32>
    %47 = arith.addf %40, %46 : vector<1x256xf32>
    %48 = vector.broadcast %3 : f32 to vector<1x256xf32>
    %49 = arith.mulf %48, %40 : vector<1x256xf32>
    %50 = vector.broadcast %3 : f32 to vector<13x256xf32>
    %51 = arith.mulf %50, %42 : vector<13x256xf32>
    %52 = math.exp %51 : vector<13x256xf32>
    %cst_24 = arith.constant dense<0.000000e+00> : vector<256xf32>
    %53 = vector.multi_reduction <add>, %52, %cst_24 [0] : vector<13x256xf32> to vector<256xf32>
    %54 = vector.shape_cast %53 : vector<256xf32> to vector<1x256xf32>
    %55 = math.log %54 : vector<1x256xf32>
    %56 = arith.addf %49, %55 : vector<1x256xf32>
    %57 = vector.broadcast %3 : f32 to vector<1x256xf32>
    %58 = arith.mulf %57, %38 : vector<1x256xf32>
    %59 = arith.subf %56, %58 : vector<1x256xf32>
    %60 = arith.subf %47, %38 : vector<1x256xf32>
    %c0_25 = arith.constant 0 : index
    %c34 = arith.constant 34 : index
    %c0_26 = arith.constant 0 : index
    %61 = vector.load %arg4[%c0_25, %c34, %c0_26] : memref<1x51x256xf32, #tpu.memory_space<vmem>>, vector<1x17x256xf32>
    %62 = vector.shape_cast %61 : vector<1x17x256xf32> to vector<17x256xf32>
    %63 = tpu.iota {dimensions = array<i32: 0>} : vector<17x256xi32>
    %64 = vector.broadcast %29 : vector<1x256xi32> to vector<17x256xi32>
    %65 = arith.cmpi eq, %63, %64 : vector<17x256xi32>
    %cst_27 = arith.constant 0.000000e+00 : f32
    %66 = vector.broadcast %cst_27 : f32 to vector<17x256xf32>
    %67 = arith.select %65, %62, %66 : vector<17x256xi1>, vector<17x256xf32>
    %cst_28 = arith.constant dense<0.000000e+00> : vector<256xf32>
    %68 = vector.multi_reduction <add>, %67, %cst_28 [0] : vector<17x256xf32> to vector<256xf32>
    %69 = vector.shape_cast %68 : vector<256xf32> to vector<1x256xf32>
    %cst_29 = arith.constant dense<0xFF800000> : vector<256xf32>
    %70 = vector.multi_reduction <maximumf>, %62, %cst_29 [0] : vector<17x256xf32> to vector<256xf32>
    %71 = vector.shape_cast %70 : vector<256xf32> to vector<1x256xf32>
    %72 = vector.broadcast %71 : vector<1x256xf32> to vector<17x256xf32>
    %73 = arith.subf %62, %72 : vector<17x256xf32>
    %74 = math.exp %73 : vector<17x256xf32>
    %cst_30 = arith.constant dense<0.000000e+00> : vector<256xf32>
    %75 = vector.multi_reduction <add>, %74, %cst_30 [0] : vector<17x256xf32> to vector<256xf32>
    %76 = vector.shape_cast %75 : vector<256xf32> to vector<1x256xf32>
    %77 = math.log %76 : vector<1x256xf32>
    %78 = arith.addf %71, %77 : vector<1x256xf32>
    %79 = vector.broadcast %4 : f32 to vector<1x256xf32>
    %80 = arith.mulf %79, %71 : vector<1x256xf32>
    %81 = vector.broadcast %4 : f32 to vector<17x256xf32>
    %82 = arith.mulf %81, %73 : vector<17x256xf32>
    %83 = math.exp %82 : vector<17x256xf32>
    %cst_31 = arith.constant dense<0.000000e+00> : vector<256xf32>
    %84 = vector.multi_reduction <add>, %83, %cst_31 [0] : vector<17x256xf32> to vector<256xf32>
    %85 = vector.shape_cast %84 : vector<256xf32> to vector<1x256xf32>
    %86 = math.log %85 : vector<1x256xf32>
    %87 = arith.addf %80, %86 : vector<1x256xf32>
    %88 = vector.broadcast %4 : f32 to vector<1x256xf32>
    %89 = arith.mulf %88, %69 : vector<1x256xf32>
    %90 = arith.subf %87, %89 : vector<1x256xf32>
    %91 = arith.subf %78, %69 : vector<1x256xf32>
    %92 = vector.extract_strided_slice %59 {offsets = [0, 0], sizes = [1, 128], strides = [1, 1]} : vector<1x256xf32> to vector<1x128xf32>
    %93 = vector.extract_strided_slice %59 {offsets = [0, 128], sizes = [1, 128], strides = [1, 1]} : vector<1x256xf32> to vector<1x128xf32>
    %94 = arith.addf %92, %93 : vector<1x128xf32>
    %95 = arith.addf %6, %94 : vector<1x128xf32>
    %96 = vector.extract_strided_slice %90 {offsets = [0, 0], sizes = [1, 128], strides = [1, 1]} : vector<1x256xf32> to vector<1x128xf32>
    %97 = vector.extract_strided_slice %90 {offsets = [0, 128], sizes = [1, 128], strides = [1, 1]} : vector<1x256xf32> to vector<1x128xf32>
    %98 = arith.addf %96, %97 : vector<1x128xf32>
    %99 = arith.addf %7, %98 : vector<1x128xf32>
    %100 = vector.extract_strided_slice %60 {offsets = [0, 0], sizes = [1, 128], strides = [1, 1]} : vector<1x256xf32> to vector<1x128xf32>
    %101 = vector.extract_strided_slice %60 {offsets = [0, 128], sizes = [1, 128], strides = [1, 1]} : vector<1x256xf32> to vector<1x128xf32>
    %102 = arith.addf %100, %101 : vector<1x128xf32>
    %103 = arith.addf %8, %102 : vector<1x128xf32>
    %104 = vector.extract_strided_slice %91 {offsets = [0, 0], sizes = [1, 128], strides = [1, 1]} : vector<1x256xf32> to vector<1x128xf32>
    %105 = vector.extract_strided_slice %91 {offsets = [0, 128], sizes = [1, 128], strides = [1, 1]} : vector<1x256xf32> to vector<1x128xf32>
    %106 = arith.addf %104, %105 : vector<1x128xf32>
    %107 = arith.addf %9, %106 : vector<1x128xf32>
    %c0_32 = arith.constant 0 : index
    %c0_33 = arith.constant 0 : index
    %c0_34 = arith.constant 0 : index
    %c0_35 = arith.constant 0 : index
    %108 = vector.load %arg6[%c0_32, %c0_33, %c0_34, %c0_35] : memref<1x1x32x128xf32, #tpu.memory_space<vmem>>, vector<1x1x21x128xf32>
    %109 = vector.shape_cast %108 : vector<1x1x21x128xf32> to vector<21x128xf32>
    %110 = arith.addf %109, %19 : vector<21x128xf32>
    %c0_36 = arith.constant 0 : index
    %c0_37 = arith.constant 0 : index
    %c0_38 = arith.constant 0 : index
    %c0_39 = arith.constant 0 : index
    %111 = vector.load %arg6[%c0_36, %c0_37, %c0_38, %c0_39] : memref<1x1x32x128xf32, #tpu.memory_space<vmem>>, vector<1x1x21x128xf32>
    %112 = vector.shape_cast %111 : vector<1x1x21x128xf32> to vector<21x128xf32>
    %113 = vector.shape_cast %110 : vector<21x128xf32> to vector<1x1x21x128xf32>
    tpu.vector_store %arg6[%c0_36, %c0_37, %c0_38, %c0_39], %113 {strides = array<i32>} : memref<1x1x32x128xf32, #tpu.memory_space<vmem>>, vector<1x1x21x128xf32>,
    %c0_40 = arith.constant 0 : index
    %c0_41 = arith.constant 0 : index
    %c24 = arith.constant 24 : index
    %c0_42 = arith.constant 0 : index
    %114 = vector.load %arg6[%c0_40, %c0_41, %c24, %c0_42] : memref<1x1x32x128xf32, #tpu.memory_space<vmem>>, vector<1x1x4x128xf32>
    %115 = vector.shape_cast %114 : vector<1x1x4x128xf32> to vector<4x128xf32>
    %116 = tpu.concatenate %95, %99, %103, %107 in 0 : vector<1x128xf32>, vector<1x128xf32>, vector<1x128xf32>, vector<1x128xf32> -> vector<4x128xf32>
    %117 = arith.addf %115, %116 : vector<4x128xf32>
    %c0_43 = arith.constant 0 : index
    %c0_44 = arith.constant 0 : index
    %c24_45 = arith.constant 24 : index
    %c0_46 = arith.constant 0 : index
    %118 = vector.load %arg6[%c0_43, %c0_44, %c24_45, %c0_46] : memref<1x1x32x128xf32, #tpu.memory_space<vmem>>, vector<1x1x4x128xf32>
    %119 = vector.shape_cast %118 : vector<1x1x4x128xf32> to vector<4x128xf32>
    %120 = vector.shape_cast %117 : vector<4x128xf32> to vector<1x1x4x128xf32>
    tpu.vector_store %arg6[%c0_43, %c0_44, %c24_45, %c0_46], %120 {strides = array<i32>} : memref<1x1x32x128xf32, #tpu.memory_space<vmem>>, vector<1x1x4x128xf32>,
    return
  }
  func.func @transform_0(%arg0: i32, %arg1: i32, %arg2: i32) -> i32 {
    %c0_i32 = arith.constant 0 : i32
    %c0_i32_0 = arith.constant 0 : i32
    return %c0_i32 : i32
  }
  func.func @transform_1(%arg0: i32, %arg1: i32, %arg2: i32) -> (i32, i32, i32) {
    %c1_i32 = arith.constant 1 : i32
    %0 = arith.muli %arg1, %c1_i32 : i32
    %1 = arith.addi %0, %arg2 : i32
    %c0_i32 = arith.constant 0 : i32
    %c0_i32_0 = arith.constant 0 : i32
    return %arg0, %c0_i32, %1 : i32, i32, i32
  }
  func.func @transform_2(%arg0: i32, %arg1: i32, %arg2: i32) -> (i32, i32, i32) {
    %c1_i32 = arith.constant 1 : i32
    %0 = arith.muli %arg1, %c1_i32 : i32
    %1 = arith.addi %0, %arg2 : i32
    %c0_i32 = arith.constant 0 : i32
    %c0_i32_0 = arith.constant 0 : i32
    return %arg0, %c0_i32, %1 : i32, i32, i32
  }
  func.func @transform_3(%arg0: i32, %arg1: i32, %arg2: i32) -> (i32, i32, i32, i32) {
    %c0_i32 = arith.constant 0 : i32
    %c0_i32_0 = arith.constant 0 : i32
    %c0_i32_1 = arith.constant 0 : i32
    return %arg0, %arg1, %c0_i32, %c0_i32_0 : i32, i32, i32, i32
  }
}

</mosaic_0001>

<bundles_post_ra>
// kernel: uncertainty_loss.1
= control target key start
LH: loop header
LB: loop body
LE: loop exit
PB: predicated region body
PF: predicated region fallthrough
CT: control target
= control target key end

     0   :  { %8 = vsyncpa [#allocation3], 0  ;;  %s1101_s12 = smov 0   ;;  %s1103_s13 = smov 0   ;;  %s1457_s0 = inlined_call_operand.vmem [shape: f32[2], index: 0, kind: input, shape index: {}]   ;;  %s1458_s1 = inlined_call_operand.vmem [shape: f32[2,51,256], index: 1, kind: input, shape index: {}]   ;;  %s1459_s2 = inlined_call_operand.vmem [shape: f32[2,23,256], index: 2, kind: input, shape index: {}]   ;;  %s1460_s3 = inlined_call_operand.vmem [shape: f32[2,1,32,128], index: 3, kind: output, shape index: {}]  }
   0x1   :  { %s1105_s14 = smov 0  }
   0x2 LB: > { %s913_s15 = sadd.s32 4294967295, %s1077_s14   ;;  %s33_s16 = sadd.s32 1, %s1073_s13  ;;  %s1077_s14 = sphi %s1105_s14, %s14_s14   ;;  %s1073_s13 = sphi %s1103_s13, %s1464_s13   ;;  %s1069_s12 = sphi %s1101_s12, %s1463_s12  }
   0x3   : > { %p35_p0 = scmp.ge.s32.totalorder %s33_s16, 2  ;;  %p915_p1 = scmp.ge.s32.totalorder %s1077_s14, 1 }
   0x4   : > { %p147_p2 = scmp.lt.s32.totalorder %s1077_s14, 3  ;;  %p1126_p4 = scmp.eq.s32.totalorder %s913_s15, 0 }
   0x5   : > { %s1466_s16 = smov (%p35_p0, %s33_s16), 0  ;;  %s160_s21 = sshll.u32 %s1457_s0, 4  ;;  %s161_s21 = int_to_ptr.vmem [resolvable:$true] %s160_s21 }
   0x6   : > { %p1122_p3 = pnand %p915_p1, %p147_p2  ;;  %s1036_s22 = scalar_lea.vmem %s161_s21, 16 }
   0x7   : > { %p1037_p7 = scmp.ne.s32.totalorder %s161_s21, %s1036_s22  ;;  %p1044_p11 = scmp.lt.s32.totalorder %s161_s21, %s161_s21 }
   0x8   : > { %p940_p5 = pneg %p1122_p3  ;;  %p1045_p12 = scmp.lt.s32.totalorder %s1036_s22, %s1036_s22 }
   0xa   : > { %p941_p6 = pnand %p1126_p4, %p940_p5  ;;  %p1046_p13 = por %p1045_p12, %p1044_p11 }
   0xc   : > { %p1038_p8 = pneg %p941_p6 }
   0xe   : > { %p1039_p9 = pnand %p1038_p8, %p1037_p7 }
  0x10   : > { %p1040_p10 = pneg %p1039_p9 }
  0x12   : > { %p1047_p0 = pnand %p1046_p13, %p1040_p10 }
  0x14   : > { %1050 = shalt.err (!%p1047_p0)
}
  0x15   : > { %s1079_s23 = smov [#allocation2]   ;;  %203 = sbr.rel (%p1122_p3) target bundleno = 156 (0x9c), region = 32 }
  0x16   : > { %943 = dma.vmem_to_smem (!%p941_p6), %s161_s21, 16, %s1079_s23, [#allocation3]  }
  0x1c   : > { %1064 = dma.done.wait (%p1126_p4), [#allocation3], 16  }
  0x1d   : > { %1066 = vsyncadd (%p1126_p4), [#allocation3], 4294967280 }
  0x1e   : > { %209 = sfence }
  0x1f   : > { %p249_p1 = scmp.lt.s32.totalorder %s1069_s12, 1  ;;  %v1080_v0 = vmov 0.0   ;;  %vm389_vm0 = vcmask 1047557   ;;  %vm391_vm1 = vcmask 1041408   ;;  %v332_v49 = vlaneseq  ;;  %s288_s9 = sld [smem:[#allocation2]] }
  0x20   : > { %vm353_vm2 = vcmask 1042432   ;;  %vm609_vm3 = vcmask 1047554   ;;  %s1290_s10 = sld [smem:[#allocation2 + $0x1]]  ;;  %vm372_vm8 = vcmask 1044480   ;;  %vm567_vm9 = vcmask 1045504  }
  0x21   : > { %s1468_s12 = smov (!%p249_p1, %s1069_s12), 1  ;;  %v1205_v56 = vshrl.u32 %v332_v49, 7 }
  0x22   : > { %s930_s24 = smul.u32 112, %s1468_s12  ;;  %s929_s25 = sshll.u32 %s1468_s12, 5 }
  0x23   : > { %s1148_s28 = scalar_lea.vmem %s1460_s3, %s929_s25  ;;  %s931_s29 = smul.u32 48, %s1468_s12  ;;  %v337_v62 = vsub.s32 0, %v1205_v56  ;;  %v341_v63 = vsub.s32 1, %v1205_v56 }
  0x24   : > { %s1153_s5 = scalar_lea.vmem %s1458_s1, %s930_s24  ;;  %286 = vst [vmem:[%s1148_s28 + $0x10] sm:$0xff] %v1080_v0  ;;  %287 = vst [vmem:[%s1148_s28 + $0x18] sm:$0xff] %v1080_v0 }
  0x25   : > { %s1160_s8 = scalar_lea.vmem %s1459_s2, %s931_s29  ;;  %v290_v1 = vld [vmem:[%s1153_s5] sm:$0xff]  ;;  %v291_v2 = vld [vmem:[%s1153_s5 + $0x8] sm:$0xff]  ;;  %v292_v3 = vld [vmem:[%s1153_s5 + $0x10] sm:$0xff] }
  0x26   : > { %v296_v4 = vld [vmem:[%s1160_s8] sm:$0xff]  ;;  %v297_v5 = vld [vmem:[%s1160_s8 + $0x8] sm:$0xff]  ;;  %v293_v6 = vld [vmem:[%s1153_s5 + $0x18] sm:$0xff] }
  0x27   : > { %v302_v7 = vsub.f32 %v290_v1, %v296_v4  ;;  %v303_v8 = vsub.f32 %v291_v2, %v297_v5  ;;  %v298_v9 = vld [vmem:[%s1160_s8 + $0x10] sm:$0xff]  ;;  %v299_v10 = vld [vmem:[%s1160_s8 + $0x18] sm:$0xff]  ;;  %v294_v11 = vld [vmem:[%s1153_s5 + $0x20] sm:$0x1f]  ;;  %v1219_v1 = vadd.s32 8, %v1205_v56 }
  0x28   : > { %v304_v12 = vsub.f32 %v292_v3, %v298_v9  ;;  %v305_v13 = vsub.f32 %v293_v6, %v299_v10  ;;  %v295_v14 = vld [vmem:[%s1153_s5 + $0x28] sm:$0x1f]  ;;  %v300_v15 = vld [vmem:[%s1160_s8 + $0x20] sm:$0x1f]  ;;  %v1177_v30 = vld [vmem:[%s1153_s5 + $0x20] sm:$0xe0]  ;;  %v1223_v3 = vstv %s288_s9 }
  0x29   : > { %v301_v16 = vld [vmem:[%s1160_s8 + $0x28] sm:$0x1f]  ;;  %v308_v17 = vmul.f32 %v302_v7, %v302_v7  ;;  %v309_v18 = vmul.f32 %v303_v8, %v303_v8  ;;  %v306_v19 = vsub.f32 %v294_v11, %v300_v15  ;;  %v1180_v31 = vld [vmem:[%s1153_s5 + $0x40] sm:$0x3]  ;;  %v1184_v32 = vld [vmem:[%s1153_s5 + $0x28] sm:$0xe0] }
  0x2a   : > { %v307_v20 = vsub.f32 %v295_v14, %v301_v16  ;;  %v310_v21 = vmul.f32 %v304_v12, %v304_v12  ;;  %v311_v22 = vmul.f32 %v305_v13, %v305_v13  ;;  %v1188_v33 = vld [vmem:[%s1153_s5 + $0x48] sm:$0x3]  ;;  %v1191_v34 = vld [vmem:[%s1153_s5 + $0x30] sm:$0xff]  ;;  %v390_v35 = vsel %vm389_vm0, %v1177_v30, -inf  ;;  %v1198_v39 = vld [vmem:[%s1153_s5 + $0x38] sm:$0xff] }
  0x2b   : > { %v314_v23 = vadd.f32 %v309_v18, %v308_v17  ;;  %v312_v24 = vmul.f32 %v306_v19, %v306_v19  ;;  %v777_v27 = vld [vmem:[%s1148_s28 + $0x10] sm:$0x1f]  ;;  %v392_v36 = vsel %vm391_vm1, %v1180_v31, -inf  ;;  %v401_v38 = vsel %vm389_vm0, %v1184_v32, -inf  ;;  %v1230_v8 = vld [vmem:[%s1153_s5 + $0x40] sm:$0xfc] }
  0x2c   : > { %v313_v25 = vmul.f32 %v307_v20, %v307_v20  ;;  %v315_v26 = vadd.f32 %v311_v22, %v310_v21  ;;  %v393_v37 = vmax.f32 %v390_v35, %v392_v36  ;;  %v402_v40 = vsel %vm391_vm1, %v1188_v33, -inf  ;;  %v925_v52 = vld [vmem:[%s1160_s8 + $0x25] ss:$8 sm:$0x3]  ;;  %v1252_v18 = vld [vmem:[%s1153_s5 + $0x60] sm:$0x7] }
  0x2d   : > { %781 = vst [vmem:[%s1148_s28] sm:$0xff] %v314_v23  ;;  %v403_v42 = vmax.f32 %v401_v38, %v402_v40  ;;  %v932_v55 = vtrunc.f32 %v925_v52  ;;  %v1212_v60 = vld [vmem:[%s1160_s8 + $0x26] ss:$8 sm:$0x3]  ;;  %v354_v5 = vrot.slane %v1177_v30, 5  ;;  %v355_v9 = vrot.slane %v1191_v34, 5  ;;  %v1272_v36 = vld [vmem:[%s1153_s5 + $0x58] sm:$0xff] }
  0x2e   : > { %v316_v28 = vadd.f32 %v313_v25, %v312_v24  ;;  %782 = vst [vmem:[%s1148_s28 + $0x8] sm:$0xff] %v315_v26  ;;  %v394_v41 = vmax.f32 %v393_v37, %v1191_v34  ;;  %v934_v4 = vtrunc.f32 %v1212_v60  ;;  %v358_v10 = vrot.slane %v1198_v39, 5  ;;  %v1249_v17 = vld [vmem:[%s1153_s5 + $0x48] sm:$0xfc] }
  0x2f   : > { %v404_v44 = vmax.f32 %v403_v42, %v1198_v39  ;;  %v933_v61 = vcvt.f32.s32 %v932_v55  ;;  %v360_v19 = vrot.slane %v1180_v31, 5  ;;  %v1257_v22 = vld [vmem:[%s1153_s5 + $0x68] sm:$0x7]  ;;  %v610_v23 = vsel %vm609_vm3, %v1230_v8, -inf }
  0x30   : > { %v780_v29 = vadd.f32 %v777_v27, %v316_v28  ;;  %v395_v43 = vrot.slane %v394_v41, 4  ;;  %v1264_v28 = vld [vmem:[%s1153_s5 + $0x50] sm:$0xff]  ;;  %v621_v38 = vsel %vm353_vm2, %v1257_v22, -inf  ;;  %v362_v40 = vrot.slane %v1188_v33, 5 }
  0x31   : > { %v405_v46 = vrot.slane %v404_v44, 4  ;;  %v1238_v13 = vrot.slane %v933_v61, %v337_v62  ;;  %v1242_v14 = vrot.slane %v933_v61, %v341_v63  ;;  %v357_v49 = vrot.slane %v1184_v32, 5 }
  0x32   : > { %783 = vst [vmem:[%s1148_s28 + $0x10] sm:$0x1f] %v780_v29  ;;  %v396_v45 = vmax.f32 %v394_v41, %v395_v43  ;;  %v611_v29 = vsel %vm353_vm2, %v1252_v18, -inf  ;;  %v361_v52 = vsel %vm353_vm2, %v355_v9, %v360_v19  ;;  %vm591_vm0 = vcmask 1040384  }
  0x33   : > { %v406_v48 = vmax.f32 %v404_v44, %v405_v46  ;;  %v612_v37 = vmax.f32 %v610_v23, %v611_v29  ;;  %vm345_vm4 = vcmp.eq.s32.totalorder %v1219_v1, %v1238_v13  ;;  %vm346_vm5 = vcmp.eq.s32.totalorder %v1219_v1, %v1242_v14 }
  0x34   : > { %v397_v47 = vrot.slane %v396_v45, 2  ;;  %vm343_vm6 = vcmp.eq.s32.totalorder %v1205_v56, %v1238_v13  ;;  %vm344_vm7 = vcmp.eq.s32.totalorder %v1205_v56, %v1242_v14 }
  0x35   : > { %v407_v51 = vrot.slane %v406_v48, 2 }
  0x36   : > { %v398_v50 = vmax.f32 %v396_v45, %v397_v47  ;;  %v613_v45 = vmax.f32 %v612_v37, %v1264_v28 }
  0x37   : > { %v408_v54 = vmax.f32 %v406_v48, %v407_v51 }
  0x38   : > { %v399_v53 = vrot.slane %v398_v50, 1 }
  0x39   : > { %v409_v58 = vrot.slane %v408_v54, 1 }
  0x3a   : > { %v1207_v57 = vmax.f32 %v398_v50, %v399_v53 }
  0x3b   : > { %v1209_v59 = vmax.f32 %v408_v54, %v409_v58 }
  0x3c   : > { %v413_v0 = vsub.f32 %v1191_v34, %v1207_v57  ;;  %v415_v2 = vsub.f32 %v1180_v31, %v1207_v57  ;;  %v411_v11 = vsub.f32 %v1177_v30, %v1207_v57  ;;  %v620_v31 = vsel %vm609_vm3, %v1249_v17, -inf }
  0x3d   : > { %v414_v6 = vsub.f32 %v1198_v39, %v1209_v59  ;;  %v412_v15 = vsub.f32 %v1184_v32, %v1209_v59  ;;  %v416_v16 = vsub.f32 %v1188_v33, %v1209_v59  ;;  %v622_v42 = vmax.f32 %v620_v31, %v621_v38 }
  0x3e   : > { %v421_v7 = vmul.f32 1.442695, %v413_v0  ;;  %v425_v12 = vmul.f32 1.442695, %v415_v2  ;;  %v417_v20 = vmul.f32 1.442695, %v411_v11  ;;  %v476_v21 = vmul.f32 %v1223_v3, %v413_v0 }
  0x3f   : > { %v419_v24 = vmul.f32 1.442695, %v412_v15  ;;  %v423_v25 = vmul.f32 1.442695, %v414_v6  ;;  %v477_v26 = vmul.f32 %v1223_v3, %v414_v6  ;;  %v478_v27 = vmul.f32 %v1223_v3, %v415_v2 }
  0x40   : > { %972 = vpow2.f32 %v421_v7  ;;  %v427_v34 = vmul.f32 1.442695, %v416_v16  ;;  %v479_v35 = vmul.f32 %v1223_v3, %v416_v16  ;;  %v484_v41 = vmul.f32 1.442695, %v476_v21 }
  0x41   : > { %974 = vpow2.f32 %v425_v12  ;;  %v474_v43 = vmul.f32 %v1223_v3, %v411_v11  ;;  %v486_v44 = vmul.f32 1.442695, %v477_v26  ;;  %v475_v46 = vmul.f32 %v1223_v3, %v412_v15 }
  0x42   : > { %976 = vpow2.f32 %v417_v20  ;;  %v488_v47 = vmul.f32 1.442695, %v478_v27  ;;  %v623_v48 = vmax.f32 %v622_v42, %v1272_v36  ;;  %v490_v50 = vmul.f32 1.442695, %v479_v35 }
  0x43   : > { %978 = vpow2.f32 %v419_v24  ;;  %v614_v33 = vrot.slane %v613_v45, 4  ;;  %v480_v53 = vmul.f32 1.442695, %v474_v43  ;;  %v363_v32 = vsel %vm353_vm2, %v358_v10, %v362_v40 }
  0x44   : > { %980 = vpow2.f32 %v423_v25  ;;  %v624_v51 = vrot.slane %v623_v48, 4  ;;  %v482_v55 = vmul.f32 1.442695, %v475_v46  ;;  %v356_v0 = vsel %vm353_vm2, %v354_v5, %v355_v9 }
  0x45   : > { %982 = vpow2.f32 %v427_v34  ;;  %v615_v54 = vmax.f32 %v613_v45, %v614_v33  ;;  %v359_v7 = vsel %vm353_vm2, %v357_v49, %v358_v10  ;;  %v370_v30 = vsel %vm345_vm4, %v361_v52, 0.0 }
  0x46   : > { %984 = vpow2.f32 %v484_v41  ;;  %v625_v58 = vmax.f32 %v623_v48, %v624_v51  ;;  %v371_v5 = vsel %vm346_vm5, %v363_v32, 0.0  ;;  %v935_v15 = vcvt.f32.s32 %v934_v4 }
  0x47   : > { %986 = vpow2.f32 %v486_v44  ;;  %v616_v2 = vrot.slane %v615_v54, 2  ;;  %v368_v10 = vsel %vm343_vm6, %v356_v0, 0.0  ;;  %v369_v23 = vsel %vm344_vm7, %v359_v7, 0.0 }
  0x48   : > { %988 = vpow2.f32 %v488_v47  ;;  %v626_v11 = vrot.slane %v625_v58, 2  ;;  %v373_v24 = vsel %vm372_vm8, %v370_v30, 0.0  ;;  %v381_v25 = vsel %vm372_vm8, %v371_v5, 0.0 }
  0x49   : > { %990 = vpow2.f32 %v490_v50  ;;  %v617_v9 = vmax.f32 %v615_v54, %v616_v2  ;;  %v1318_v31 = vadd.s32 16, %v1205_v56  ;;  %v1322_v37 = vadd.f32 %v373_v24, %v368_v10 }
  0x4a   : > { %v973_v61 = vpop.eup %972  ;;  %992 = vpow2.f32 %v480_v53  ;;  %v627_v39 = vmax.f32 %v625_v58, %v626_v11  ;;  %v1324_v14 = vadd.f32 %v381_v25, %v369_v23  ;;  %v1328_v40 = vstv %s1290_s10 }
  0x4b   : > { %v975_v6 = vpop.eup %974  ;;  %994 = vpow2.f32 %v482_v55  ;;  %v436_v19 = vrot.slane %v973_v61, 5  ;;  %v618_v21 = vrot.slane %v617_v9, 1  ;;  %v1332_v43 = vrot.slane %v935_v15, %v337_v62 }
  0x4c   : > { %v977_v12 = vpop.eup %976  ;;  %v441_v20 = vrot.slane %v975_v6, 5  ;;  %v628_v60 = vrot.slane %v627_v39, 1  ;;  %v1336_v44 = vrot.slane %v935_v15, %v341_v63  ;;  %v568_v45 = vrot.slane %v1230_v8, 2 }
  0x4d   : > { %v979_v16 = vpop.eup %978  ;;  %v435_v26 = vrot.slane %v977_v12, 5  ;;  %v1315_v27 = vmax.f32 %v617_v9, %v618_v21  ;;  %vm555_vm10 = vcmp.eq.s32.totalorder %v1205_v56, %v1332_v43  ;;  %v569_v21 = vrot.slane %v1264_v28, 2 }
  0x4e   : > { %v981_v13 = vpop.eup %980  ;;  %v1320_v34 = vmax.f32 %v627_v39, %v628_v60  ;;  %v442_v38 = vsel %vm353_vm2, %v436_v19, %v441_v20  ;;  %v438_v42 = vrot.slane %v979_v16, 5  ;;  %v572_v23 = vrot.slane %v1272_v36, 2 }
  0x4f   : > { %v983_v4 = vpop.eup %982  ;;  %v437_v47 = vsel %vm353_vm2, %v435_v26, %v436_v19  ;;  %v439_v48 = vrot.slane %v981_v13, 5  ;;  %v630_v50 = vsub.f32 %v1230_v8, %v1315_v27  ;;  %v449_v33 = vsel %vm372_vm8, %v442_v38, 0.0 }
  0x50   : > { %v985_v29 = vpop.eup %984  ;;  %v443_v49 = vrot.slane %v983_v4, 5  ;;  %v631_v62 = vsub.f32 %v1249_v17, %v1320_v34  ;;  %v632_v63 = vsub.f32 %v1264_v28, %v1315_v27  ;;  %v633_v32 = vsub.f32 %v1272_v36, %v1320_v34 }
  0x51   : > { %v987_v35 = vpop.eup %986  ;;  %v499_v51 = vrot.slane %v985_v29, 5  ;;  %v636_v55 = vmul.f32 1.442695, %v630_v50  ;;  %v634_v0 = vsub.f32 %v1252_v18, %v1315_v27  ;;  %v440_v7 = vsel %vm353_vm2, %v438_v42, %v439_v48 }
  0x52   : > { %v989_v41 = vpop.eup %988  ;;  %v502_v53 = vrot.slane %v987_v35, 5  ;;  %v638_v2 = vmul.f32 1.442695, %v631_v62  ;;  %v640_v6 = vmul.f32 1.442695, %v632_v63  ;;  %v444_v11 = vsel %vm353_vm2, %v439_v48, %v443_v49 }
  0x53   : > { %v991_v46 = vpop.eup %990  ;;  %v504_v54 = vrot.slane %v989_v41, 5  ;;  %996 = vpow2.f32 %v636_v55  ;;  %v642_v30 = vmul.f32 1.442695, %v633_v32  ;;  %v635_v9 = vsub.f32 %v1257_v22, %v1320_v34 }
  0x54   : > { %v993_v52 = vpop.eup %992  ;;  %v506_v61 = vrot.slane %v991_v46, 5  ;;  %998 = vpow2.f32 %v638_v2  ;;  %v644_v12 = vmul.f32 1.442695, %v634_v0  ;;  %v450_v15 = vadd.f32 %v449_v33, %v437_v47 }
  0x55   : > { %v995_v58 = vpop.eup %994  ;;  %v498_v5 = vrot.slane %v993_v52, 5  ;;  %v505_v16 = vsel %vm353_vm2, %v499_v51, %v504_v54  ;;  %1000 = vpow2.f32 %v640_v6  ;;  %v457_v10 = vsel %vm372_vm8, %v444_v11, 0.0 }
  0x56   : > { %v501_v39 = vrot.slane %v995_v58, 5  ;;  %v507_v19 = vsel %vm353_vm2, %v502_v53, %v506_v61  ;;  %1002 = vpow2.f32 %v642_v30  ;;  %v646_v20 = vmul.f32 1.442695, %v635_v9 }
  0x57   : > { %v571_v13 = vrot.slane %v1249_v17, 2  ;;  %1004 = vpow2.f32 %v644_v12  ;;  %v500_v24 = vsel %vm353_vm2, %v498_v5, %v499_v51  ;;  %v512_v25 = vsel %vm372_vm8, %v505_v16, 0.0 }
  0x58   : > { %vm556_vm11 = vcmp.eq.s32.totalorder %v1205_v56, %v1336_v44  ;;  %vm557_vm12 = vcmp.eq.s32.totalorder %v1219_v1, %v1332_v43  ;;  %v697_v60 = vmul.f32 %v1328_v40, %v630_v50  ;;  %v698_v4 = vmul.f32 %v1328_v40, %v631_v62 }
  0x59   : > { %v458_v28 = vadd.f32 %v457_v10, %v440_v7  ;;  %v503_v17 = vsel %vm353_vm2, %v501_v39, %v502_v53  ;;  %v520_v36 = vsel %vm372_vm8, %v507_v19, 0.0  ;;  %v699_v26 = vmul.f32 %v1328_v40, %v632_v63 }
  0x5a   : > { %v451_v29 = vrot.slane %v450_v15, 4  ;;  %v574_v35 = vrot.slane %v1252_v18, 2  ;;  %1006 = vpow2.f32 %v646_v20  ;;  %v700_v38 = vmul.f32 %v1328_v40, %v633_v32 }
  0x5b   : > { %v513_v41 = vadd.f32 %v512_v25, %v500_v24  ;;  %vm558_vm13 = vcmp.eq.s32.totalorder %v1219_v1, %v1336_v44  ;;  %vm559_vm14 = vcmp.eq.s32.totalorder %v1318_v31, %v1332_v43  ;;  %vm560_vm15 = vcmp.eq.s32.totalorder %v1318_v31, %v1336_v44 }
  0x5c   : > { %v576_v42 = vrot.slane %v1257_v22, 2  ;;  %v701_v46 = vmul.f32 %v1328_v40, %v634_v0  ;;  %v703_v47 = vmul.f32 1.442695, %v697_v60  ;;  %v521_v18 = vadd.f32 %v520_v36, %v503_v17 }
  0x5d   : > { %v570_v48 = vsel %vm567_vm9, %v568_v45, %v569_v21  ;;  %v702_v49 = vmul.f32 %v1328_v40, %v635_v9  ;;  %v705_v50 = vmul.f32 1.442695, %v698_v4  ;;  %v997_v33 = vpop.eup %996  ;;  %v459_v51 = vrot.slane %v458_v28, 4 }
  0x5e   : > { %v573_v62 = vsel %vm567_vm9, %v571_v13, %v572_v23  ;;  %1008 = vpow2.f32 %v703_v47  ;;  %v707_v63 = vmul.f32 1.442695, %v699_v26  ;;  %v999_v52 = vpop.eup %998  ;;  %v452_v22 = vadd.f32 %v451_v29, %v450_v15 }
  0x5f   : > { %v575_v53 = vsel %vm567_vm9, %v569_v21, %v574_v35  ;;  %v654_v54 = vrot.slane %v997_v33, 2  ;;  %v709_v32 = vmul.f32 1.442695, %v700_v38  ;;  %v1001_v55 = vpop.eup %1000  ;;  %v514_v58 = vrot.slane %v513_v41, 4 }
  0x60   : > { %v577_v8 = vsel %vm567_vm9, %v572_v23, %v576_v42  ;;  %v584_v45 = vsel %vm555_vm10, %v570_v48, 0.0  ;;  %v711_v61 = vmul.f32 1.442695, %v701_v46  ;;  %v1003_v0 = vpop.eup %1002  ;;  %v522_v2 = vrot.slane %v521_v18, 4 }
  0x61   : > { %v655_v6 = vrot.slane %v1001_v55, 2  ;;  %1010 = vpow2.f32 %v705_v50  ;;  %v713_v7 = vmul.f32 1.442695, %v702_v49  ;;  %v1005_v11 = vpop.eup %1004  ;;  %v460_v30 = vadd.f32 %v459_v51, %v458_v28 }
  0x62   : > { %v657_v5 = vrot.slane %v999_v52, 2  ;;  %v658_v9 = vrot.slane %v1003_v0, 2  ;;  %1012 = vpow2.f32 %v707_v63  ;;  %v453_v12 = vrot.slane %v452_v22, 2 }
  0x63   : > { %v656_v15 = vsel %vm567_vm9, %v654_v54, %v655_v6  ;;  %v660_v39 = vrot.slane %v1005_v11, 2  ;;  %1014 = vpow2.f32 %v709_v32  ;;  %v515_v16 = vadd.f32 %v514_v58, %v513_v41 }
  0x64   : > { %v585_v10 = vsel %vm556_vm11, %v573_v62, 0.0  ;;  %v586_v19 = vsel %vm557_vm12, %v575_v53, 0.0  ;;  %1016 = vpow2.f32 %v711_v61  ;;  %v1007_v20 = vpop.eup %1006  ;;  %v523_v21 = vadd.f32 %v522_v2, %v521_v18 }
  0x65   : > { %v661_v13 = vsel %vm567_vm9, %v655_v6, %v660_v39  ;;  %v671_v23 = vsel %vm591_vm0, %v660_v39, 0.0  ;;  %1018 = vpow2.f32 %v713_v7  ;;  %v461_v24 = vrot.slane %v460_v30, 2 }
  0x66   : > { %v659_v25 = vsel %vm567_vm9, %v657_v5, %v658_v9  ;;  %v662_v60 = vrot.slane %v1007_v20, 2  ;;  %v670_v4 = vadd.f32 %v661_v13, %v656_v15  ;;  %v454_v28 = vadd.f32 %v453_v12, %v452_v22 }
  0x67   : > { %v587_v56 = vsel %vm558_vm13, %v577_v8, 0.0  ;;  %v588_v17 = vsel %vm559_vm14, %v574_v35, 0.0  ;;  %v589_v36 = vsel %vm560_vm15, %v576_v42, 0.0  ;;  %v516_v29 = vrot.slane %v515_v16, 2 }
  0x68   : > { %v1009_v26 = vpop.eup %1008  ;;  %v663_v38 = vsel %vm567_vm9, %v658_v9, %v662_v60  ;;  %v672_v41 = vadd.f32 %v671_v23, %v670_v4  ;;  %v680_v46 = vsel %vm591_vm0, %v662_v60, 0.0  ;;  %v375_v47 = vrot.slane %v1322_v37, 4 }
  0x69   : > { %v524_v18 = vrot.slane %v523_v21, 2  ;;  %v590_v1 = vadd.f32 %v586_v19, %v584_v45  ;;  %v679_v48 = vadd.f32 %v663_v38, %v659_v25  ;;  %v462_v49 = vadd.f32 %v461_v24, %v460_v30 }
  0x6a   : > { %v592_v43 = vsel %vm591_vm0, %v588_v17, 0.0  ;;  %v600_v35 = vadd.f32 %v587_v56, %v585_v10  ;;  %v673_v50 = vrot.slane %v672_v41, 4  ;;  %v455_v31 = vrot.slane %v454_v28, 1 }
  0x6b   : > { %v1011_v33 = vpop.eup %1010  ;;  %v601_v44 = vsel %vm591_vm0, %v589_v36, 0.0  ;;  %v681_v42 = vadd.f32 %v680_v46, %v679_v48  ;;  %v721_v51 = vrot.slane %v1009_v26, 2  ;;  %v383_v63 = vrot.slane %v1324_v14, 4 }
  0x6c   : > { %v1013_v62 = vpop.eup %1012  ;;  %v517_v52 = vadd.f32 %v516_v29, %v515_v16  ;;  %v674_v22 = vadd.f32 %v673_v50, %v672_v41  ;;  %v724_v53 = vrot.slane %v1011_v33, 2  ;;  %v525_v32 = vadd.f32 %v524_v18, %v523_v21 }
  0x6d   : > { %v1015_v54 = vpop.eup %1014  ;;  %v593_v55 = vadd.f32 %v592_v43, %v590_v1  ;;  %v682_v58 = vrot.slane %v681_v42, 4  ;;  %v722_v8 = vrot.slane %v1013_v62, 2  ;;  %v463_v61 = vrot.slane %v462_v49, 1 }
  0x6e   : > { %v1017_v45 = vpop.eup %1016  ;;  %v602_v0 = vadd.f32 %v601_v44, %v600_v35  ;;  %v675_v2 = vrot.slane %v674_v22, 2  ;;  %v725_v6 = vrot.slane %v1015_v54, 2  ;;  %v456_v11 = vadd.f32 %v455_v31, %v454_v28 }
  0x6f   : > { %v1019_v7 = vpop.eup %1018  ;;  %v683_v30 = vadd.f32 %v682_v58, %v681_v42  ;;  %v723_v5 = vsel %vm567_vm9, %v721_v51, %v722_v8  ;;  %v727_v9 = vrot.slane %v1017_v45, 2  ;;  %v518_v12 = vrot.slane %v517_v52, 1 }
  0x70   : > { %v676_v15 = vadd.f32 %v675_v2, %v674_v22  ;;  %v726_v39 = vsel %vm567_vm9, %v724_v53, %v725_v6  ;;  %v729_v16 = vrot.slane %v1019_v7, 2  ;;  %v526_v10 = vrot.slane %v525_v32, 1 }
  0x71   : > { %v684_v19 = vrot.slane %v683_v30, 2  ;;  %v728_v20 = vsel %vm567_vm9, %v722_v8, %v727_v9  ;;  %v738_v21 = vsel %vm591_vm0, %v727_v9, 0.0  ;;  %v464_v60 = vadd.f32 %v463_v61, %v462_v49 }
  0x72   : > { %v677_v13 = vrot.slane %v676_v15, 1  ;;  %v730_v23 = vsel %vm567_vm9, %v725_v6, %v729_v16  ;;  %v737_v24 = vadd.f32 %v728_v20, %v723_v5  ;;  %v747_v25 = vsel %vm591_vm0, %v729_v16, 0.0 }
  0x73   : > { %v685_v4 = vadd.f32 %v684_v19, %v683_v30  ;;  %v746_v28 = vadd.f32 %v730_v23, %v726_v39  ;;  %v376_v56 = vadd.f32 %v375_v47, %v1322_v37  ;;  %v384_v17 = vadd.f32 %v383_v63, %v1324_v14 }
  0x74   : > { %v519_v36 = vadd.f32 %v518_v12, %v517_v52  ;;  %v739_v26 = vadd.f32 %v738_v21, %v737_v24  ;;  %v527_v29 = vadd.f32 %v526_v10, %v525_v32  ;;  %v594_v38 = vrot.slane %v593_v55, 4 }
  0x75   : > { %v686_v41 = vrot.slane %v685_v4, 1  ;;  %v748_v46 = vadd.f32 %v747_v25, %v746_v28  ;;  %1020 = vlog2.f32 %v456_v11  ;;  %v603_v18 = vrot.slane %v602_v0, 4 }
  0x76   : > { %v678_v1 = vadd.f32 %v677_v13, %v676_v15  ;;  %v740_v48 = vrot.slane %v739_v26, 4  ;;  %1022 = vlog2.f32 %v464_v60  ;;  %v377_v49 = vrot.slane %v376_v56, 2 }
  0x77   : > { %v687_v43 = vadd.f32 %v686_v41, %v685_v4  ;;  %v749_v35 = vrot.slane %v748_v46, 4  ;;  %1024 = vlog2.f32 %v519_v36  ;;  %v385_v33 = vrot.slane %v384_v17, 2 }
  0x78   : > { %v741_v50 = vadd.f32 %v740_v48, %v739_v26  ;;  %1026 = vlog2.f32 %v527_v29  ;;  %v595_v37 = vadd.f32 %v594_v38, %v593_v55  ;;  %v604_v47 = vadd.f32 %v603_v18, %v602_v0 }
  0x79   : > { %v750_v14 = vadd.f32 %v749_v35, %v748_v46  ;;  %1028 = vlog2.f32 %v678_v1  ;;  %v378_v51 = vadd.f32 %v377_v49, %v376_v56  ;;  %v386_v62 = vadd.f32 %v385_v33, %v384_v17 }
  0x7a   : > { %v742_v31 = vrot.slane %v741_v50, 2  ;;  %1030 = vlog2.f32 %v687_v43  ;;  %v596_v63 = vrot.slane %v595_v37, 2  ;;  %v605_v22 = vrot.slane %v604_v47, 2 }
  0x7b   : > { %v751_v44 = vrot.slane %v750_v14, 2  ;;  %v379_v45 = vrot.slane %v378_v51, 1  ;;  %v387_v61 = vrot.slane %v386_v62, 1  ;;  %v472_v12 = vmul.f32 %v1223_v3, %v1207_v57 }
  0x7c   : > { %v743_v42 = vadd.f32 %v742_v31, %v741_v50  ;;  %v597_v55 = vadd.f32 %v596_v63, %v595_v37  ;;  %v606_v6 = vadd.f32 %v605_v22, %v604_v47  ;;  %v473_v39 = vmul.f32 %v1223_v3, %v1209_v59 }
  0x7d   : > { %v752_v52 = vadd.f32 %v751_v44, %v750_v14  ;;  %v380_v5 = vadd.f32 %v379_v45, %v378_v51  ;;  %v388_v9 = vadd.f32 %v387_v61, %v386_v62  ;;  %v695_v26 = vmul.f32 %v1328_v40, %v1315_v27  ;;  %v784_v51 = vld [vmem:[%s1148_s28 + $0x18] sm:$0xf] }
  0x7e   : > { %v744_v53 = vrot.slane %v743_v42, 1  ;;  %v598_v15 = vrot.slane %v597_v55, 1  ;;  %v607_v19 = vrot.slane %v606_v6, 1  ;;  %v696_v46 = vmul.f32 %v1328_v40, %v1320_v34 }
  0x7f   : > { %v753_v54 = vrot.slane %v752_v52, 1  ;;  %v1021_v32 = vpop.eup %1020  ;;  %v534_v24 = vmul.f32 %v1223_v3, %v380_v5  ;;  %v535_v28 = vmul.f32 %v1223_v3, %v388_v9 }
  0x80   : > { %v745_v58 = vadd.f32 %v744_v53, %v743_v42  ;;  %v1023_v8 = vpop.eup %1022  ;;  %v466_v20 = vmul.f32 0.6931472, %v1021_v32  ;;  %v599_v25 = vadd.f32 %v598_v15, %v597_v55  ;;  %v608_v56 = vadd.f32 %v607_v19, %v606_v6 }
  0x81   : > { %v754_v2 = vadd.f32 %v753_v54, %v752_v52  ;;  %v1025_v0 = vpop.eup %1024  ;;  %v468_v21 = vmul.f32 0.6931472, %v1023_v8 }
  0x82   : > { %1032 = vlog2.f32 %v745_v58  ;;  %v1027_v7 = vpop.eup %1026  ;;  %v529_v16 = vmul.f32 0.6931472, %v1025_v0  ;;  %v469_v17 = vadd.f32 %v466_v20, %v1207_v57  ;;  %v761_v3 = vmul.f32 %v1328_v40, %v599_v25 }
  0x83   : > { %1034 = vlog2.f32 %v754_v2  ;;  %v1029_v11 = vpop.eup %1028  ;;  %v531_v10 = vmul.f32 0.6931472, %v1027_v7  ;;  %v470_v36 = vadd.f32 %v468_v21, %v1209_v59  ;;  %v762_v59 = vmul.f32 %v1328_v40, %v608_v56 }
  0x84   : > { %v1031_v30 = vpop.eup %1030  ;;  %v689_v13 = vmul.f32 0.6931472, %v1029_v11  ;;  %v532_v60 = vadd.f32 %v529_v16, %v472_v12  ;;  %v538_v35 = vsub.f32 %v469_v17, %v380_v5 }
  0x85   : > { %v691_v23 = vmul.f32 0.6931472, %v1031_v30  ;;  %v533_v4 = vadd.f32 %v531_v10, %v473_v39  ;;  %v539_v49 = vsub.f32 %v470_v36, %v388_v9 }
  0x86   : > { %v692_v38 = vadd.f32 %v689_v13, %v1315_v27  ;;  %v536_v48 = vsub.f32 %v532_v60, %v534_v24 }
  0x87   : > { %v693_v41 = vadd.f32 %v691_v23, %v1320_v34  ;;  %v537_v57 = vsub.f32 %v533_v4, %v535_v28  ;;  %v771_v31 = vadd.f32 %v539_v49, %v538_v35 }
  0x88   : > { %v765_v33 = vsub.f32 %v692_v38, %v599_v25 }
  0x89   : > { %v766_v37 = vsub.f32 %v693_v41, %v608_v56  ;;  %v767_v34 = vadd.f32 %v537_v57, %v536_v48 }
  0x8b   : > { %v773_v42 = vadd.f32 %v766_v37, %v765_v33 }
  0x8c   : > { %v1033_v29 = vpop.eup %1032 }
  0x8d   : > { %v1035_v18 = vpop.eup %1034  ;;  %v756_v1 = vmul.f32 0.6931472, %v1033_v29 }
  0x8e   : > { %v758_v43 = vmul.f32 0.6931472, %v1035_v18 }
  0x8f   : > { %v759_v50 = vadd.f32 %v756_v1, %v695_v26 }
  0x90   : > { %v760_v27 = vadd.f32 %v758_v43, %v696_v46 }
  0x91   : > { %v763_v14 = vsub.f32 %v759_v50, %v761_v3 }
  0x92   : > { %v764_v47 = vsub.f32 %v760_v27, %v762_v59 }
  0x94   : > { %v769_v44 = vadd.f32 %v764_v47, %v763_v14 }
  0x96   : > { %v785_v62 = vsel %vm591_vm0, %v767_v34, %v769_v44 }
  0x97   : > { %v786_v63 = vsel %vm391_vm1, %v785_v62, %v771_v31 }
  0x98   : > { %v787_v40 = vsel %vm353_vm2, %v786_v63, %v773_v42 }
  0x99   : > { %v788_v52 = vadd.f32 %v787_v40, %v784_v51 }
  0x9b   : > { %789 = vst [vmem:[%s1148_s28 + $0x18] sm:$0xf] %v788_v52 }
  0x9c PF: > { %s14_s14 = sadd.s32 1, %s1077_s14   ;;  %s1463_s12 = smov %s1073_s13 }
  0x9d   : > { %p11_p2 = scmp.ge.s32.totalorder %s14_s14, 4   ;;  %s1464_s13 = smov %s1466_s16 }
  0x9f   :  { %13 = sbr.rel (!%p11_p2) target bundleno = 2 (0x2), region = 76 }
  0xa6   :  { %819 = vsyncpa [#allocation3], 1 }
  0xa7   :  { %821 = vsyncpa [#allocation3 + $0x1], 1 }

</bundles_post_ra>
